<compile_context>
chip_gen: v6e
topology: v6e:2x2x1
jax: 0.10.0
libtpu: 0.0.40
codegen_flags: <defaults>
</compile_context>

<pallas_src>
import functools

import jax
import jax.numpy as jnp
from jax.experimental import pallas as pl
from jax.experimental.pallas import tpu as pltpu

IN_FEATURES = 28 * 28  # 784
HIDDEN = 10
OUT_FEATURES = 10


def _round_up(n, m):
    return ((n + m - 1) // m) * m


def mlp_kernel(x_ref, w1_ref, b1_ref, w2_ref, b2_ref, w3_ref, b3_ref, o_ref):
    # One batch tile of x lives in VMEM; weights/biases are VMEM-resident.
    x = x_ref[...]
    h1 = jnp.dot(x, w1_ref[...], preferred_element_type=jnp.float32) + b1_ref[...]
    h1 = jnp.maximum(h1, 0.0)
    h2 = jnp.dot(h1, w2_ref[...], preferred_element_type=jnp.float32) + b2_ref[...]
    h2 = jnp.maximum(h2, 0.0)
    out = jnp.dot(h2, w3_ref[...], preferred_element_type=jnp.float32) + b3_ref[...]
    o_ref[...] = out.astype(o_ref.dtype)


def prepare_params(params):
    """One-time conversion from PyTorch layout (out,in)/(out,) to kernel layout.

    Hoisted out of the forward pass so the transposes/reshapes are not
    re-dispatched on every call.
    """
    return {
        "w1": jnp.asarray(params["w1"]).T,           # (784, 10)
        "b1": jnp.asarray(params["b1"]).reshape(1, -1),
        "w2": jnp.asarray(params["w2"]).T,           # (10, 10)
        "b2": jnp.asarray(params["b2"]).reshape(1, -1),
        "w3": jnp.asarray(params["w3"]).T,           # (10, 10)
        "b3": jnp.asarray(params["b3"]).reshape(1, -1),
    }


@functools.partial(jax.jit, static_argnames=("block_rows",))
def pt_mlp_forward(x, prepared, *, block_rows=1024):
    """x: [B, 784] float32. prepared: output of prepare_params()."""
    B = x.shape[0]
    # Tile: at most `block_rows` rows, at least a multiple of 8 (sublane).
    tb = min(block_rows, _round_up(max(B, 1), 8))
    b_pad = _round_up(B, tb)
    if b_pad != B:
        x = jnp.pad(x, ((0, b_pad - B), (0, 0)))

    const2d = lambda i: (0, 0)
    out = pl.pallas_call(
        mlp_kernel,
        out_shape=jax.ShapeDtypeStruct((b_pad, OUT_FEATURES), jnp.float32),
        grid=(b_pad // tb,),
        in_specs=[
            # x: batch-tiled, double-buffered across grid steps.
            pl.BlockSpec((tb, IN_FEATURES), lambda i: (i, 0)),
            # weights/biases: constant block index -> resident in VMEM.
            pl.BlockSpec((IN_FEATURES, HIDDEN), const2d),
            pl.BlockSpec((1, HIDDEN), const2d),
            pl.BlockSpec((HIDDEN, HIDDEN), const2d),
            pl.BlockSpec((1, HIDDEN), const2d),
            pl.BlockSpec((HIDDEN, OUT_FEATURES), const2d),
            pl.BlockSpec((1, OUT_FEATURES), const2d),
        ],
        out_specs=pl.BlockSpec((tb, OUT_FEATURES), lambda i: (i, 0)),
        compiler_params=pltpu.CompilerParams(
            dimension_semantics=("parallel",),
        ),
    )(
        x,
        prepared["w1"], prepared["b1"],
        prepared["w2"], prepared["b2"],
        prepared["w3"], prepared["b3"],
    )
    return out[:B]


def init_params(key):
    """Deterministic init matching nn.Linear default (uniform +-1/sqrt(fan_in))."""
    ks = jax.random.split(key, 6)

    def linear(kw, kb, fan_in, fan_out):
        bound = 1.0 / jnp.sqrt(fan_in)
        w = jax.random.uniform(kw, (fan_out, fan_in), jnp.float32, -bound, bound)
        b = jax.random.uniform(kb, (fan_out,), jnp.float32, -bound, bound)
        return w, b

    w1, b1 = linear(ks[0], ks[1], IN_FEATURES, HIDDEN)
    w2, b2 = linear(ks[2], ks[3], HIDDEN, HIDDEN)
    w3, b3 = linear(ks[4], ks[5], HIDDEN, OUT_FEATURES)
    return {"w1": w1, "b1": b1, "w2": w2, "b2": b2, "w3": w3, "b3": b3}


def _reference(x, p):
    h = jnp.maximum(x @ p["w1"].T + p["b1"], 0.0)
    h = jnp.maximum(h @ p["w2"].T + p["b2"], 0.0)
    return h @ p["w3"].T + p["b3"]


if __name__ == "__main__":
    key = jax.random.PRNGKey(0)
    k_params, k_x1, k_x2 = jax.random.split(key, 3)
    params = init_params(k_params)
    prepared = prepare_params(params)  # one-time layout prep, outside forward

    # Small, sublane-aligned batch.
    B = 8
    x = jax.random.normal(k_x1, (B, IN_FEATURES), jnp.float32)
    out = jax.block_until_ready(pt_mlp_forward(x, prepared))
    expected = _reference(x, params)
    assert out.shape == (B, OUT_FEATURES)
    assert jnp.allclose(out, expected, atol=1e-5, rtol=1e-5)

    # Ragged batch (not a multiple of the tile) to exercise the padding path.
    B2 = 13
    x2 = jax.random.normal(k_x2, (B2, IN_FEATURES), jnp.float32)
    out2 = jax.block_until_ready(pt_mlp_forward(x2, prepared))
    expected2 = _reference(x2, params)
    assert out2.shape == (B2, OUT_FEATURES)
    assert jnp.allclose(out2, expected2, atol=1e-5, rtol=1e-5)

    print("KERNEL_OK")
</pallas_src>

<mosaic_0001>
module attributes {stable_mosaic.version = 11 : i64} {
  func.func @mlp_kernel(%arg0: i32, %arg1: memref<8x784xf32, #tpu.memory_space<vmem>>, %arg2: memref<784x10xf32, #tpu.memory_space<vmem>>, %arg3: memref<1x10xf32, #tpu.memory_space<vmem>>, %arg4: memref<10x10xf32, #tpu.memory_space<vmem>>, %arg5: memref<1x10xf32, #tpu.memory_space<vmem>>, %arg6: memref<10x10xf32, #tpu.memory_space<vmem>>, %arg7: memref<1x10xf32, #tpu.memory_space<vmem>>, %arg8: memref<8x10xf32, #tpu.memory_space<vmem>>) attributes {dimension_semantics = [#tpu.dimension_semantics<parallel>], iteration_bounds = array<i64: 1>, scalar_prefetch = 0 : i64, scratch_operands = 0 : i64, tpu.core_type = #tpu.core_type<tc>, window_params = [{transform_indices = @transform_0, window_bounds = array<i64: 8, 784>}, {pipeline_mode = #tpu.pipeline_mode<synchronous>, transform_indices = @transform_1, window_bounds = array<i64: 784, 10>}, {pipeline_mode = #tpu.pipeline_mode<synchronous>, transform_indices = @transform_2, window_bounds = array<i64: 1, 10>}, {pipeline_mode = #tpu.pipeline_mode<synchronous>, transform_indices = @transform_3, window_bounds = array<i64: 10, 10>}, {pipeline_mode = #tpu.pipeline_mode<synchronous>, transform_indices = @transform_4, window_bounds = array<i64: 1, 10>}, {pipeline_mode = #tpu.pipeline_mode<synchronous>, transform_indices = @transform_5, window_bounds = array<i64: 10, 10>}, {pipeline_mode = #tpu.pipeline_mode<synchronous>, transform_indices = @transform_6, window_bounds = array<i64: 1, 10>}, {transform_indices = @transform_7, window_bounds = array<i64: 8, 10>}]} {
    %c0 = arith.constant 0 : index
    %c0_0 = arith.constant 0 : index
    %0 = vector.load %arg1[%c0, %c0_0] : memref<8x784xf32, #tpu.memory_space<vmem>>, vector<8x784xf32>
    %c0_1 = arith.constant 0 : index
    %c0_2 = arith.constant 0 : index
    %1 = vector.load %arg2[%c0_1, %c0_2] : memref<784x10xf32, #tpu.memory_space<vmem>>, vector<784x10xf32>
    %cst = arith.constant dense<0.000000e+00> : vector<8x10xf32>
    %2 = tpu.matmul %0, %1, %cst {dimension_numbers = #tpu.dot_dimension_numbers<[1], [0], [0], [1], [0, 0, 1, 1], [], []>} : vector<8x784xf32>, vector<784x10xf32>, vector<8x10xf32> -> vector<8x10xf32>
    %c0_3 = arith.constant 0 : index
    %c0_4 = arith.constant 0 : index
    %3 = vector.load %arg3[%c0_3, %c0_4] : memref<1x10xf32, #tpu.memory_space<vmem>>, vector<1x10xf32>
    %4 = vector.broadcast %3 : vector<1x10xf32> to vector<8x10xf32>
    %5 = arith.addf %2, %4 : vector<8x10xf32>
    %cst_5 = arith.constant 0.000000e+00 : f32
    %6 = vector.broadcast %cst_5 : f32 to vector<8x10xf32>
    %7 = arith.maximumf %5, %6 : vector<8x10xf32>
    %c0_6 = arith.constant 0 : index
    %c0_7 = arith.constant 0 : index
    %8 = vector.load %arg4[%c0_6, %c0_7] : memref<10x10xf32, #tpu.memory_space<vmem>>, vector<10x10xf32>
    %cst_8 = arith.constant dense<0.000000e+00> : vector<8x10xf32>
    %9 = tpu.matmul %7, %8, %cst_8 {dimension_numbers = #tpu.dot_dimension_numbers<[1], [0], [0], [1], [0, 0, 1, 1], [], []>} : vector<8x10xf32>, vector<10x10xf32>, vector<8x10xf32> -> vector<8x10xf32>
    %c0_9 = arith.constant 0 : index
    %c0_10 = arith.constant 0 : index
    %10 = vector.load %arg5[%c0_9, %c0_10] : memref<1x10xf32, #tpu.memory_space<vmem>>, vector<1x10xf32>
    %11 = vector.broadcast %10 : vector<1x10xf32> to vector<8x10xf32>
    %12 = arith.addf %9, %11 : vector<8x10xf32>
    %cst_11 = arith.constant 0.000000e+00 : f32
    %13 = vector.broadcast %cst_11 : f32 to vector<8x10xf32>
    %14 = arith.maximumf %12, %13 : vector<8x10xf32>
    %c0_12 = arith.constant 0 : index
    %c0_13 = arith.constant 0 : index
    %15 = vector.load %arg6[%c0_12, %c0_13] : memref<10x10xf32, #tpu.memory_space<vmem>>, vector<10x10xf32>
    %cst_14 = arith.constant dense<0.000000e+00> : vector<8x10xf32>
    %16 = tpu.matmul %14, %15, %cst_14 {dimension_numbers = #tpu.dot_dimension_numbers<[1], [0], [0], [1], [0, 0, 1, 1], [], []>} : vector<8x10xf32>, vector<10x10xf32>, vector<8x10xf32> -> vector<8x10xf32>
    %c0_15 = arith.constant 0 : index
    %c0_16 = arith.constant 0 : index
    %17 = vector.load %arg7[%c0_15, %c0_16] : memref<1x10xf32, #tpu.memory_space<vmem>>, vector<1x10xf32>
    %18 = vector.broadcast %17 : vector<1x10xf32> to vector<8x10xf32>
    %19 = arith.addf %16, %18 : vector<8x10xf32>
    %c0_17 = arith.constant 0 : index
    %c0_18 = arith.constant 0 : index
    %20 = vector.load %arg8[%c0_17, %c0_18] : memref<8x10xf32, #tpu.memory_space<vmem>>, vector<8x10xf32>
    tpu.vector_store %arg8[%c0_17, %c0_18], %19 {strides = array<i32>} : memref<8x10xf32, #tpu.memory_space<vmem>>, vector<8x10xf32>,
    return
  }
  func.func @transform_0(%arg0: i32) -> (i32, i32) {
    %c0_i32 = arith.constant 0 : i32
    %c0_i32_0 = arith.constant 0 : i32
    return %arg0, %c0_i32 : i32, i32
  }
  func.func @transform_1(%arg0: i32) -> (i32, i32) {
    %c0_i32 = arith.constant 0 : i32
    %c0_i32_0 = arith.constant 0 : i32
    %c0_i32_1 = arith.constant 0 : i32
    return %c0_i32, %c0_i32_0 : i32, i32
  }
  func.func @transform_2(%arg0: i32) -> (i32, i32) {
    %c0_i32 = arith.constant 0 : i32
    %c0_i32_0 = arith.constant 0 : i32
    %c0_i32_1 = arith.constant 0 : i32
    return %c0_i32, %c0_i32_0 : i32, i32
  }
  func.func @transform_3(%arg0: i32) -> (i32, i32) {
    %c0_i32 = arith.constant 0 : i32
    %c0_i32_0 = arith.constant 0 : i32
    %c0_i32_1 = arith.constant 0 : i32
    return %c0_i32, %c0_i32_0 : i32, i32
  }
  func.func @transform_4(%arg0: i32) -> (i32, i32) {
    %c0_i32 = arith.constant 0 : i32
    %c0_i32_0 = arith.constant 0 : i32
    %c0_i32_1 = arith.constant 0 : i32
    return %c0_i32, %c0_i32_0 : i32, i32
  }
  func.func @transform_5(%arg0: i32) -> (i32, i32) {
    %c0_i32 = arith.constant 0 : i32
    %c0_i32_0 = arith.constant 0 : i32
    %c0_i32_1 = arith.constant 0 : i32
    return %c0_i32, %c0_i32_0 : i32, i32
  }
  func.func @transform_6(%arg0: i32) -> (i32, i32) {
    %c0_i32 = arith.constant 0 : i32
    %c0_i32_0 = arith.constant 0 : i32
    %c0_i32_1 = arith.constant 0 : i32
    return %c0_i32, %c0_i32_0 : i32, i32
  }
  func.func @transform_7(%arg0: i32) -> (i32, i32) {
    %c0_i32 = arith.constant 0 : i32
    %c0_i32_0 = arith.constant 0 : i32
    return %arg0, %c0_i32 : i32, i32
  }
}

</mosaic_0001>

<bundles_post_ra>
// kernel: pt_mlp_forward.1
= control target key start
LH: loop header
LB: loop body
LE: loop exit
PB: predicated region body
PF: predicated region fallthrough
CT: control target
= control target key end

     0   :  { %s1179_s0 = inlined_call_operand.vmem [shape: f32[8,784], index: 0, kind: input, shape index: {}]   ;;  %s1180_s1 = inlined_call_operand.vmem [shape: f32[784,10], index: 1, kind: input, shape index: {}]   ;;  %s1181_s2 = inlined_call_operand.vmem [shape: f32[1,10], index: 2, kind: input, shape index: {}]   ;;  %s1182_s3 = inlined_call_operand.vmem [shape: f32[10,10], index: 3, kind: input, shape index: {}]   ;;  %s1183_s4 = inlined_call_operand.vmem [shape: f32[1,10], index: 4, kind: input, shape index: {}]   ;;  %s1184_s5 = inlined_call_operand.vmem [shape: f32[10,10], index: 5, kind: input, shape index: {}]   ;;  %s1185_s6 = inlined_call_operand.vmem [shape: f32[1,10], index: 6, kind: input, shape index: {}]   ;;  %s1186_s7 = inlined_call_operand.hbm [shape: f32[8,10], index: 7, kind: output, shape index: {}]  }
   0x1   :  { %v65_v0 = vld [vmem:[%s1180_s1 + $0xf8] sm:$0xff]  ;;  %v64_v2 = vld [vmem:[%s1180_s1 + $0xf0] sm:$0xff]  ;;  %v63_v6 = vld [vmem:[%s1180_s1 + $0xe8] sm:$0xff] }
   0x2   :  { %v49_v1 = vld [vmem:[%s1180_s1 + $0x78] sm:$0xff]  ;;  %620 = vmatprep.subr.mxu0 %v65_v0  ;;  %v48_v4 = vld [vmem:[%s1180_s1 + $0x70] sm:$0xff]  ;;  %v47_v8 = vld [vmem:[%s1180_s1 + $0x68] sm:$0xff] }
   0x3   :  { %v97_v3 = vld [vmem:[%s1180_s1 + $0x1f8] sm:$0xff]  ;;  %621 = vmatpush3.msra.mxu0 %v49_v1  ;;  %v96_v7 = vld [vmem:[%s1180_s1 + $0x1f0] sm:$0xff]  ;;  %v95_v10 = vld [vmem:[%s1180_s1 + $0x1e8] sm:$0xff] }
   0x4   :  { %v81_v5 = vld [vmem:[%s1180_s1 + $0x178] sm:$0xff]  ;;  %655 = vmatprep.subr.mxu1 %v97_v3  ;;  %622 = vmatprep.subr.mxu0 %v64_v2  ;;  %v80_v9 = vld [vmem:[%s1180_s1 + $0x170] sm:$0xff]  ;;  %v62_v11 = vld [vmem:[%s1180_s1 + $0xe0] sm:$0xff] }
   0x5   :  { %656 = vmatpush3.msra.mxu1 %v81_v5  ;;  %623 = vmatpush3.msra.mxu0 %v48_v4  ;;  %v79_v12 = vld [vmem:[%s1180_s1 + $0x168] sm:$0xff]  ;;  %v46_v13 = vld [vmem:[%s1180_s1 + $0x60] sm:$0xff]  ;;  %v61_v15 = vld [vmem:[%s1180_s1 + $0xd8] sm:$0xff] }
   0x6   :  { %657 = vmatprep.subr.mxu1 %v96_v7  ;;  %624 = vmatprep.subr.mxu0 %v63_v6  ;;  %v94_v14 = vld [vmem:[%s1180_s1 + $0x1e0] sm:$0xff]  ;;  %v45_v17 = vld [vmem:[%s1180_s1 + $0x58] sm:$0xff]  ;;  %v60_v19 = vld [vmem:[%s1180_s1 + $0xd0] sm:$0xff] }
   0x7   :  { %658 = vmatpush3.msra.mxu1 %v80_v9  ;;  %625 = vmatpush3.msra.mxu0 %v47_v8  ;;  %v78_v16 = vld [vmem:[%s1180_s1 + $0x160] sm:$0xff]  ;;  %v93_v18 = vld [vmem:[%s1180_s1 + $0x1d8] sm:$0xff]  ;;  %v44_v21 = vld [vmem:[%s1180_s1 + $0x50] sm:$0xff] }
   0x8   :  { %659 = vmatprep.subr.mxu1 %v95_v10  ;;  %626 = vmatprep.subr.mxu0 %v62_v11  ;;  %v77_v20 = vld [vmem:[%s1180_s1 + $0x158] sm:$0xff]  ;;  %v92_v22 = vld [vmem:[%s1180_s1 + $0x1d0] sm:$0xff]  ;;  %v59_v23 = vld [vmem:[%s1180_s1 + $0xc8] sm:$0xff] }
   0x9   :  { %660 = vmatpush3.msra.mxu1 %v79_v12  ;;  %627 = vmatpush3.msra.mxu0 %v46_v13  ;;  %v76_v24 = vld [vmem:[%s1180_s1 + $0x150] sm:$0xff]  ;;  %v43_v25 = vld [vmem:[%s1180_s1 + $0x48] sm:$0xff]  ;;  %v58_v27 = vld [vmem:[%s1180_s1 + $0xc0] sm:$0xff] }
   0xa   :  { %661 = vmatprep.subr.mxu1 %v94_v14  ;;  %628 = vmatprep.subr.mxu0 %v61_v15  ;;  %v91_v26 = vld [vmem:[%s1180_s1 + $0x1c8] sm:$0xff]  ;;  %v42_v29 = vld [vmem:[%s1180_s1 + $0x40] sm:$0xff]  ;;  %v57_v31 = vld [vmem:[%s1180_s1 + $0xb8] sm:$0xff] }
   0xb   :  { %662 = vmatpush3.msra.mxu1 %v78_v16  ;;  %629 = vmatpush3.msra.mxu0 %v45_v17  ;;  %v75_v28 = vld [vmem:[%s1180_s1 + $0x148] sm:$0xff]  ;;  %v90_v30 = vld [vmem:[%s1180_s1 + $0x1c0] sm:$0xff]  ;;  %v41_v33 = vld [vmem:[%s1180_s1 + $0x38] sm:$0xff] }
   0xc   :  { %663 = vmatprep.subr.mxu1 %v93_v18  ;;  %630 = vmatprep.subr.mxu0 %v60_v19  ;;  %v74_v32 = vld [vmem:[%s1180_s1 + $0x140] sm:$0xff]  ;;  %v89_v34 = vld [vmem:[%s1180_s1 + $0x1b8] sm:$0xff]  ;;  %v56_v35 = vld [vmem:[%s1180_s1 + $0xb0] sm:$0xff] }
   0xd   :  { %664 = vmatpush3.msra.mxu1 %v77_v20  ;;  %631 = vmatpush3.msra.mxu0 %v44_v21  ;;  %v73_v36 = vld [vmem:[%s1180_s1 + $0x138] sm:$0xff]  ;;  %v40_v37 = vld [vmem:[%s1180_s1 + $0x30] sm:$0xff]  ;;  %v55_v39 = vld [vmem:[%s1180_s1 + $0xa8] sm:$0xff] }
   0xe   :  { %665 = vmatprep.subr.mxu1 %v92_v22  ;;  %632 = vmatprep.subr.mxu0 %v59_v23  ;;  %v88_v38 = vld [vmem:[%s1180_s1 + $0x1b0] sm:$0xff]  ;;  %v39_v41 = vld [vmem:[%s1180_s1 + $0x28] sm:$0xff]  ;;  %v54_v43 = vld [vmem:[%s1180_s1 + $0xa0] sm:$0xff] }
   0xf   :  { %666 = vmatpush3.msra.mxu1 %v76_v24  ;;  %633 = vmatpush3.msra.mxu0 %v43_v25  ;;  %v72_v40 = vld [vmem:[%s1180_s1 + $0x130] sm:$0xff]  ;;  %v87_v42 = vld [vmem:[%s1180_s1 + $0x1a8] sm:$0xff]  ;;  %v38_v45 = vld [vmem:[%s1180_s1 + $0x20] sm:$0xff] }
  0x10   :  { %667 = vmatprep.subr.mxu1 %v91_v26  ;;  %634 = vmatprep.subr.mxu0 %v58_v27  ;;  %v71_v44 = vld [vmem:[%s1180_s1 + $0x128] sm:$0xff]  ;;  %v86_v46 = vld [vmem:[%s1180_s1 + $0x1a0] sm:$0xff]  ;;  %v53_v47 = vld [vmem:[%s1180_s1 + $0x98] sm:$0xff] }
  0x11   :  { %668 = vmatpush3.msra.mxu1 %v75_v28  ;;  %635 = vmatpush3.msra.mxu0 %v42_v29  ;;  %v70_v48 = vld [vmem:[%s1180_s1 + $0x120] sm:$0xff]  ;;  %v37_v49 = vld [vmem:[%s1180_s1 + $0x18] sm:$0xff]  ;;  %v52_v51 = vld [vmem:[%s1180_s1 + $0x90] sm:$0xff] }
  0x12   :  { %669 = vmatprep.subr.mxu1 %v90_v30  ;;  %636 = vmatprep.subr.mxu0 %v57_v31  ;;  %v85_v50 = vld [vmem:[%s1180_s1 + $0x198] sm:$0xff]  ;;  %v36_v53 = vld [vmem:[%s1180_s1 + $0x10] sm:$0xff]  ;;  %v51_v55 = vld [vmem:[%s1180_s1 + $0x88] sm:$0xff] }
  0x13   :  { %670 = vmatpush3.msra.mxu1 %v74_v32  ;;  %637 = vmatpush3.msra.mxu0 %v41_v33  ;;  %v69_v52 = vld [vmem:[%s1180_s1 + $0x118] sm:$0xff]  ;;  %v84_v54 = vld [vmem:[%s1180_s1 + $0x190] sm:$0xff]  ;;  %v35_v57 = vld [vmem:[%s1180_s1 + $0x8] sm:$0xff] }
  0x14   :  { %671 = vmatprep.subr.mxu1 %v89_v34  ;;  %638 = vmatprep.subr.mxu0 %v56_v35  ;;  %v68_v56 = vld [vmem:[%s1180_s1 + $0x110] sm:$0xff]  ;;  %v83_v58 = vld [vmem:[%s1180_s1 + $0x188] sm:$0xff]  ;;  %v50_v59 = vld [vmem:[%s1180_s1 + $0x80] sm:$0xff] }
  0x15   :  { %672 = vmatpush3.msra.mxu1 %v73_v36  ;;  %639 = vmatpush3.msra.mxu0 %v40_v37  ;;  %v28_v60 = vld [vmem:[%s1179_s0 + $0x8] sm:$0xff]  ;;  %v34_v61 = vld [vmem:[%s1180_s1] sm:$0xff]  ;;  %v129_v1 = vld [vmem:[%s1180_s1 + $0x2f8] sm:$0xff] }
  0x16   :  { %673 = vmatprep.subr.mxu1 %v88_v38  ;;  %640 = vmatprep.subr.mxu0 %v55_v39  ;;  %v67_v62 = vld [vmem:[%s1180_s1 + $0x108] sm:$0xff]  ;;  %v27_v63 = vld [vmem:[%s1179_s0] sm:$0xff]  ;;  %v30_v3 = vld [vmem:[%s1179_s0 + $0x18] sm:$0xff] }
  0x17   :  { %674 = vmatpush3.msra.mxu1 %v72_v40  ;;  %641 = vmatpush3.msra.mxu0 %v39_v41  ;;  %v82_v0 = vld [vmem:[%s1180_s1 + $0x180] sm:$0xff]  ;;  %v113_v4 = vld [vmem:[%s1180_s1 + $0x278] sm:$0xff]  ;;  %v29_v5 = vld [vmem:[%s1179_s0 + $0x10] sm:$0xff] }
  0x18   :  { %675 = vmatprep.subr.mxu1 %v87_v42  ;;  %642 = vmatprep.subr.mxu0 %v54_v43  ;;  %v66_v2 = vld [vmem:[%s1180_s1 + $0x100] sm:$0xff]  ;;  %v128_v6 = vld [vmem:[%s1180_s1 + $0x2f0] sm:$0xff]  ;;  %v32_v8 = vld [vmem:[%s1179_s0 + $0x28] sm:$0xff] }
  0x19   :  { %676 = vmatpush3.msra.mxu1 %v71_v44  ;;  %643 = vmatpush3.msra.mxu0 %v38_v45  ;;  %v112_v7 = vld [vmem:[%s1180_s1 + $0x270] sm:$0xff]  ;;  %v127_v9 = vld [vmem:[%s1180_s1 + $0x2e8] sm:$0xff] }
  0x1a   :  { %677 = vmatprep.subr.mxu1 %v86_v46  ;;  %644 = vmatprep.subr.mxu0 %v53_v47 }
  0x1b   :  { %678 = vmatpush3.msra.mxu1 %v70_v48  ;;  %645 = vmatpush3.msra.mxu0 %v37_v49 }
  0x1c   :  { %679 = vmatprep.subr.mxu1 %v85_v50  ;;  %646 = vmatprep.subr.mxu0 %v52_v51 }
  0x1d   :  { %680 = vmatpush3.msra.mxu1 %v69_v52  ;;  %647 = vmatpush3.msra.mxu0 %v36_v53 }
  0x1e   :  { %681 = vmatprep.subr.mxu1 %v84_v54  ;;  %648 = vmatprep.subr.mxu0 %v51_v55 }
  0x1f   :  { %682 = vmatpush3.msra.mxu1 %v68_v56  ;;  %649 = vmatpush3.msra.mxu0 %v35_v57 }
  0x20   :  { %683 = vmatprep.subr.mxu1 %v83_v58  ;;  %650 = vmatprep.subr.mxu0 %v50_v59 }
  0x21   :  { %207 = vmatprep.mubr.f32.mxu0 %v28_v60  ;;  %651 = vmatpush3.msra.mxu0 %v34_v61 }
  0x22   :  { %684 = vmatpush3.msra.mxu1 %v67_v62  ;;  %208 = vmatmul.mubr.f32.vlgmr.msra.gmra.mxu0 %v27_v63 }
  0x23   :  { %685 = vmatprep.subr.mxu1 %v82_v0  ;;  %690 = vmatprep.subr.mxu0 %v129_v1 }
  0x24   :  { %686 = vmatpush3.msra.mxu1 %v66_v2  ;;  %277 = vmatprep.mubr.f32.mxu1 %v30_v3 }
  0x25   :  { %691 = vmatpush3.msra.mxu0 %v113_v4 }
  0x26   :  { %12 = vsyncpa [#allocation3], 0  ;;  %278 = vmatmul.mubr.f32.vlgmr.msra.gmra.mxu1 %v29_v5  ;;  %692 = vmatprep.subr.mxu0 %v128_v6  ;;  %v111_v10 = vld [vmem:[%s1180_s1 + $0x268] sm:$0xff]  ;;  %v126_v12 = vld [vmem:[%s1180_s1 + $0x2e0] sm:$0xff]  ;;  %v780_v14 = vmov 0.0   ;;  %vm139_vm0 = vcmask 130048  }
  0x27   :  { %v131_v11 = vld [vmem:[%s1180_s1 + $0x308] sm:$0xff]  ;;  %693 = vmatpush3.msra.mxu0 %v112_v7  ;;  %347 = vmatprep.mubr.f32.mxu0 %v32_v8  ;;  %v110_v13 = vld [vmem:[%s1180_s1 + $0x260] sm:$0xff]  ;;  %v125_v16 = vld [vmem:[%s1180_s1 + $0x2d8] sm:$0xff]  ;;  %vm781_vm1 = vmmov 0   ;;  %vm437_vm2 = vcmask 1041408   ;;  %vm433_vm3 = vcmask 80896  }
  0x28   :  { %694 = vmatprep.subr.mxu0 %v127_v9  ;;  %734 = vmatprep.subr.mxu1 %v780_v14  ;;  %v130_v15 = vld [vmem:[%s1180_s1 + $0x300] sm:$0xff]  ;;  %v109_v17 = vld [vmem:[%s1180_s1 + $0x258] sm:$0xff]  ;;  %v33_v18 = vld [vmem:[%s1179_s0 + $0x30] sm:$0xff]  ;;  %s782_s14 = smov [#allocation2]  }
  0x29   :  { %695 = vmatpush3.msra.mxu0 %v111_v10  ;;  %735 = vmatpush3.msra.mxu1 %v131_v11  ;;  %v124_v19 = vld [vmem:[%s1180_s1 + $0x2d0] sm:$0xff]  ;;  %v123_v21 = vld [vmem:[%s1180_s1 + $0x2c8] sm:$0xff]  ;;  %v122_v23 = vld [vmem:[%s1180_s1 + $0x2c0] sm:$0xff]  ;;  %s604_s15 = sshll.u32 %s782_s14, 4  ;;  %s605_s15 = int_to_ptr.vmem [resolvable:$true] %s604_s15 }
  0x2a   :  { %696 = vmatprep.subr.mxu0 %v126_v12  ;;  %736 = vmatprep.subr.mxu1 %v780_v14  ;;  %v108_v20 = vld [vmem:[%s1180_s1 + $0x250] sm:$0xff]  ;;  %v107_v22 = vld [vmem:[%s1180_s1 + $0x248] sm:$0xff]  ;;  %v106_v24 = vld [vmem:[%s1180_s1 + $0x240] sm:$0xff]  ;;  %p763_p1 = scmp.lt.s32.totalorder %s605_s15, %s605_s15 }
  0x2b   :  { %697 = vmatpush3.msra.mxu0 %v110_v13  ;;  %737 = vmatpush3.msra.mxu1 %v130_v15  ;;  %v121_v25 = vld [vmem:[%s1180_s1 + $0x2b8] sm:$0xff]  ;;  %v120_v27 = vld [vmem:[%s1180_s1 + $0x2b0] sm:$0xff]  ;;  %v119_v29 = vld [vmem:[%s1180_s1 + $0x2a8] sm:$0xff] }
  0x2c   :  { %698 = vmatprep.subr.mxu0 %v125_v16  ;;  %738 = vmatprep.mubr.msk.f32.mxu1 %vm781_vm1, %v780_v14  ;;  %v105_v26 = vld [vmem:[%s1180_s1 + $0x238] sm:$0xff]  ;;  %v104_v28 = vld [vmem:[%s1180_s1 + $0x230] sm:$0xff]  ;;  %v103_v30 = vld [vmem:[%s1180_s1 + $0x228] sm:$0xff] }
  0x2d   :  { %699 = vmatpush3.msra.mxu0 %v109_v17  ;;  %739 = vmatmul.mubr.msk.f32.vlgmr.msra.gmra.mxu1 %vm139_vm0, %v33_v18  ;;  %v118_v31 = vld [vmem:[%s1180_s1 + $0x2a0] sm:$0xff]  ;;  %v117_v33 = vld [vmem:[%s1180_s1 + $0x298] sm:$0xff]  ;;  %v116_v35 = vld [vmem:[%s1180_s1 + $0x290] sm:$0xff] }
  0x2e   :  { %700 = vmatprep.subr.mxu0 %v124_v19  ;;  %741 = vmatprep.subr.mxu1 %v780_v14  ;;  %v102_v32 = vld [vmem:[%s1180_s1 + $0x220] sm:$0xff]  ;;  %v101_v34 = vld [vmem:[%s1180_s1 + $0x218] sm:$0xff]  ;;  %v100_v36 = vld [vmem:[%s1180_s1 + $0x210] sm:$0xff] }
  0x2f   :  { %701 = vmatpush3.msra.mxu0 %v108_v20  ;;  %745 = vmatprep.mubr.msk.f32.mxu1 %vm781_vm1, %v780_v14  ;;  %v115_v37 = vld [vmem:[%s1180_s1 + $0x288] sm:$0xff]  ;;  %v114_v39 = vld [vmem:[%s1180_s1 + $0x280] sm:$0xff] }
  0x30   :  { %702 = vmatprep.subr.mxu0 %v123_v21  ;;  %v99_v38 = vld [vmem:[%s1180_s1 + $0x208] sm:$0xff]  ;;  %v98_v40 = vld [vmem:[%s1180_s1 + $0x200] sm:$0xff] }
  0x31   :  { %703 = vmatpush3.msra.mxu0 %v107_v22  ;;  %v31_v41 = vld [vmem:[%s1179_s0 + $0x20] sm:$0xff]  ;;  %v425_v42 = vld [vmem:[%s1182_s3 + $0x8] sm:$0x3] }
  0x32   :  { %704 = vmatprep.subr.mxu0 %v122_v23  ;;  %742 = vmatpush3.msk.msra.mxu1 %vm437_vm2, %v425_v42  ;;  %v424_v43 = vld [vmem:[%s1182_s3] sm:$0xff]  ;;  %v513_v61 = vld [vmem:[%s1184_s5 + $0x8] sm:$0x3] }
  0x33   :  { %705 = vmatpush3.msra.mxu0 %v106_v24  ;;  %743 = vmatprep.subr.mxu1 %v780_v14  ;;  %v612_v51 = vld [vmem:[%s1181_s2] ss:$0 sm:$0xff] }
  0x34   :  { %706 = vmatprep.subr.mxu0 %v121_v25  ;;  %744 = vmatpush3.msra.mxu1 %v424_v43  ;;  %v512_v62 = vld [vmem:[%s1184_s5] sm:$0xff]  ;;  %s758_s5 = scalar_lea.vmem %s605_s15, 128 }
  0x35   :  { %707 = vmatpush3.msra.mxu0 %v105_v26  ;;  %748 = vmatprep.subr.mxu1 %v780_v14  ;;  %v614_v63 = vld [vmem:[%s1183_s4] ss:$0 sm:$0xff]  ;;  %p759_p0 = scmp.ne.s32.totalorder %s605_s15, %s758_s5  ;;  %p764_p2 = scmp.lt.s32.totalorder %s758_s5, %s758_s5 }
  0x36   :  { %708 = vmatprep.subr.mxu0 %v120_v27  ;;  %v617_v4 = vld [vmem:[%s1185_s6] ss:$0 sm:$0xff] }
  0x37   :  { %709 = vmatpush3.msra.mxu0 %v104_v28  ;;  %p765_p3 = por %p764_p2, %p763_p1 }
  0x38   :  { %710 = vmatprep.subr.mxu0 %v119_v29 }
  0x39   :  { %711 = vmatpush3.msra.mxu0 %v103_v30  ;;  %p766_p4 = pnand %p765_p3, %p759_p0 }
  0x3a   :  { %712 = vmatprep.subr.mxu0 %v118_v31 }
  0x3b   :  { %713 = vmatpush3.msra.mxu0 %v102_v32 }
  0x3c   :  { %714 = vmatprep.subr.mxu0 %v117_v33 }
  0x3d   :  { %715 = vmatpush3.msra.mxu0 %v101_v34 }
  0x3e   :  { %716 = vmatprep.subr.mxu0 %v116_v35 }
  0x3f   :  { %717 = vmatpush3.msra.mxu0 %v100_v36 }
  0x40   :  { %718 = vmatprep.subr.mxu0 %v115_v37 }
  0x41   :  { %719 = vmatpush3.msra.mxu0 %v99_v38 }
  0x42   :  { %720 = vmatprep.subr.mxu0 %v114_v39 }
  0x43   :  { %721 = vmatpush3.msra.mxu0 %v98_v40 }
  0x44   :  { %348 = vmatmul.mubr.f32.vlgmr.msra.gmra.mxu0 %v31_v41 }
  0xe2   :  { %v652_v48 = vpop.f32.mrf.mxu0 }
  0xe4   :  { %v653_v49 = vpop.f32.mrf.mxu0 }
  0xe5   :  { %v654_v50 = vadd.f32 %v653_v49, %v652_v48 }
  0xe6   :  { %v687_v44 = vpop.f32.mrf.mxu1 }
  0xe7   :  { %v210_v52 = vadd.f32 %v654_v50, %v612_v51 }
  0xe8   :  { %v688_v45 = vpop.f32.mrf.mxu1 }
  0xe9   :  { %v689_v53 = vadd.f32 %v688_v45, %v687_v44 }
  0xeb   :  { %v280_v56 = vadd.f32 %v689_v53, %v210_v52 }
  0xed   :  { %v419_v46 = vpop.f32.mrf.mxu1 }
  0xef   :  { %v740_v47 = vpop.f32.mrf.mxu1 }
 0x104   :  { %v722_v54 = vpop.f32.mrf.mxu0 }
 0x106   :  { %v723_v55 = vpop.f32.mrf.mxu0 }
 0x107   :  { %v724_v57 = vadd.f32 %v723_v55, %v722_v54 }
 0x109   :  { %v350_v58 = vadd.f32 %v724_v57, %v280_v56 }
 0x10b   :  { %v420_v59 = vadd.f32 %v419_v46, %v350_v58 }
 0x10d   :  { %v423_v60 = vmax.f32 %v420_v59, 0.0 }
 0x10f   :  { %746 = vmatmul.mubr.msk.f32.vlgmr.msra.gmra.mxu1 %vm433_vm3, %v423_v60 }
 0x110   :  { %752 = vmatprep.mubr.msk.f32.mxu1 %vm781_vm1, %v780_v14  ;;  %749 = vmatpush3.msk.msra.mxu1 %vm437_vm2, %v513_v61 }
 0x111   :  { %750 = vmatprep.subr.mxu1 %v780_v14 }
 0x112   :  { %751 = vmatpush3.msra.mxu1 %v512_v62 }
 0x1cf   :  { %v507_v0 = vpop.f32.mrf.mxu1 }
 0x1d0   :  { %v508_v1 = vadd.f32 %v614_v63, %v507_v0 }
 0x1d1   :  { %v747_v2 = vpop.f32.mrf.mxu1 }
 0x1d2   :  { %v511_v3 = vmax.f32 %v508_v1, 0.0 }
 0x1d4   :  { %753 = vmatmul.mubr.msk.f32.vlgmr.msra.gmra.mxu1 %vm433_vm3, %v511_v3 }
 0x294   :  { %v593_v5 = vpop.f32.mrf.mxu1 }
 0x295   :  { %v594_v6 = vadd.f32 %v617_v4, %v593_v5 }
 0x296   :  { %v754_v7 = vpop.f32.mrf.mxu1 }
 0x297   :  { %597 = vst.msk [vmem:[#allocation2] sm:$0xff] %vm433_vm3, %v594_v6 }
 0x298   :  { %769 = shalt.err (!%p766_p4)
}
 0x299   :  { %607 = dma.vmem_to_hbm [thread:$0]  %s605_s15, 128, %s1186_s7, [#allocation3]  }
 0x29a   :  { %778 = dma.done.wait [#allocation3], 128  }
 0x29b   :  { %779 = vsyncadd [#allocation3], 4294967168 }
 0x29c   :  { %611 = vsyncpa [#allocation3], 1 }

</bundles_post_ra>
